<compile_context>
chip_gen: v5e
topology: v5e:2x2
jax: 0.10.0
libtpu: 0.0.40
codegen_flags: <defaults>
</compile_context>

<pallas_src>
import functools

import jax
import jax.numpy as jnp
from jax import lax
from jax.experimental import pallas as pl
from jax.experimental.pallas import tpu as pltpu


def _round_up(x: int, m: int) -> int:
    return ((x + m - 1) // m) * m


def _vmem_budget_bytes() -> int:
    """Generation-aware VMEM budget (~75% of physical, capped at 100 MiB)."""
    phys = 128 * 1024 * 1024
    try:
        info = pltpu.get_tpu_info()
        phys = int(getattr(info, "vmem_capacity_bytes", phys))
    except Exception:  # CPU emulation / older runtimes: keep the safe default.
        pass
    return min(phys * 3 // 4, 100 * 1024 * 1024)


def _fit_caps(tm, tn, tk, xb, wb, budget):
    """Shrink tile caps until the (triple-buffered weight) working set fits."""
    def ws(tm_, tn_, tk_):
        return (2 * tm_ * tk_ * xb        # x tiles (double buffered)
                + 3 * tk_ * tn_ * wb      # weight tiles (leave room for 3 bufs)
                + 2 * tm_ * tn_ * 4       # f32 output tiles
                + 2 * tn_ * 4)            # bias tiles
    while ws(tm, tn, tk) > int(budget * 0.8):
        if tk > 512:
            tk //= 2
        elif tn > 256:
            tn //= 2
        elif tm > 64:
            tm //= 2
        else:
            break
    return tm, tn, tk


def _pick_tile(dim: int, cap: int):
    """Pick a lane-dense (multiple-of-128) tile <= cap and the padded dim size.

    Prefers a tile that divides round_up(dim, 128) (no extra padding); falls
    back to padding up to a multiple of `cap` if no decent divisor exists.
    """
    cap = max(128, (cap // 128) * 128)
    dp128 = _round_up(dim, 128)
    if dp128 <= cap:
        return dp128, dp128
    units = dp128 // 128
    cap_units = cap // 128
    best = max(d for d in range(1, cap_units + 1) if units % d == 0)
    if best * 128 * 2 >= cap:          # divisor tile is at least half the cap
        return best * 128, dp128
    return cap, _round_up(dim, cap)    # accept a little extra one-time padding


def _linear_bias_kernel(x_ref, w_ref, b_ref, o_ref):
    # x_ref: [TM, TK]   activations tile (compute dtype)
    # w_ref: [TK, TN]   weight tile, already transposed to canonical RHS layout
    # b_ref: [1,  TN]   f32 bias tile for this N block
    # o_ref: [TM, TN]   f32 output tile, resident across the K axis (accumulator)
    k = pl.program_id(2)

    @pl.when(k == 0)
    def _():
        o_ref[...] = jnp.zeros_like(o_ref)

    o_ref[...] += jnp.dot(x_ref[...], w_ref[...],
                          preferred_element_type=jnp.float32)

    @pl.when(k == pl.num_programs(2) - 1)
    def _():
        o_ref[...] += b_ref[...]


@functools.partial(
    jax.jit,
    static_argnames=("d_out", "tm", "tn", "tk", "vmem_limit", "w_buffers"))
def _forward(x, w_p, b_p, *, d_out, tm, tn, tk, vmem_limit, w_buffers):
    B, d_in = x.shape
    kp, n_p = w_p.shape
    mp = _round_up(B, tm)

    x_c = x.astype(w_p.dtype)
    if mp != B or kp != d_in:                      # only the small activation
        x_c = jnp.pad(x_c, ((0, mp - B), (0, kp - d_in)))

    grid = (mp // tm, n_p // tn, kp // tk)
    n_i, n_j, _ = grid

    w_kwargs = {}
    if w_buffers > 2:
        w_kwargs["pipeline_mode"] = pl.Buffered(w_buffers)

    itemsize = jnp.dtype(w_p.dtype).itemsize
    cost = pl.CostEstimate(
        flops=2 * B * d_in * d_out,
        transcendentals=0,
        bytes_accessed=(x_c.size * itemsize * n_j      # x re-read per N tile
                        + w_p.size * itemsize * n_i    # W re-read per M tile
                        + b_p.size * 4
                        + mp * n_p * 4),
    )

    out = pl.pallas_call(
        _linear_bias_kernel,
        out_shape=jax.ShapeDtypeStruct((mp, n_p), jnp.float32),
        grid_spec=pltpu.PrefetchScalarGridSpec(
            num_scalar_prefetch=0,
            grid=grid,
            in_specs=[
                pl.BlockSpec((tm, tk), lambda i, j, k: (i, k)),            # x
                pl.BlockSpec((tk, tn), lambda i, j, k: (k, j), **w_kwargs),  # W.T
                pl.BlockSpec((1, tn), lambda i, j, k: (0, j)),             # bias
            ],
            out_specs=pl.BlockSpec((tm, tn), lambda i, j, k: (i, j)),
        ),
        compiler_params=pltpu.CompilerParams(
            dimension_semantics=("parallel", "parallel", "arbitrary"),
            vmem_limit_bytes=vmem_limit,
        ),
        cost_estimate=cost,
    )(x_c, w_p, b_p)

    if mp != B or n_p != d_out:
        out = out[:B, :d_out]
    return out


class PallasClassifier:
    """Pallas-TPU equivalent of the PyTorch `Classifier` (y = x @ W.T + b)."""

    def __init__(self, weight, bias, *, compute_dtype=jnp.bfloat16,
                 tm_cap=256, tn_cap=1024, tk_cap=2048):
        d_out, d_in = weight.shape
        self.d_out, self.d_in = int(d_out), int(d_in)
        self.compute_dtype = jnp.dtype(compute_dtype)

        self.vmem_limit = _vmem_budget_bytes()
        cb = self.compute_dtype.itemsize
        tm_cap, tn_cap, tk_cap = _fit_caps(tm_cap, tn_cap, tk_cap, cb, cb,
                                           self.vmem_limit)

        # dtype-aware minimum sublane tile: f32 -> 8, bf16 -> 16, int8/fp8 -> 32
        self.sublane = max(8, 32 // cb)
        self.tm_cap = max(self.sublane, (tm_cap // self.sublane) * self.sublane)
        self.tk, self.k_p = _pick_tile(self.d_in, tk_cap)
        self.tn, self.n_p = _pick_tile(self.d_out, tn_cap)

        # One-time parameter prep (amortized across all forward calls):
        # pad, transpose to [D_in_p, D_out_p] (canonical [TK, TN] RHS tiles,
        # no per-K-step transpose), and cast to the compute dtype.
        w = jnp.asarray(weight, jnp.float32)
        if self.n_p != self.d_out or self.k_p != self.d_in:
            w = jnp.pad(w, ((0, self.n_p - self.d_out),
                            (0, self.k_p - self.d_in)))
        self.w_p = jnp.transpose(w).astype(self.compute_dtype)   # [Kp, Np]

        b = jnp.asarray(bias, jnp.float32)
        if self.n_p != self.d_out:
            b = jnp.pad(b, (0, self.n_p - self.d_out))
        self.b_p = b.reshape(1, self.n_p)

    def __call__(self, x):
        B = x.shape[0]
        tm = min(self.tm_cap, _round_up(B, self.sublane))
        tn = self.tn
        m_tiles = _round_up(B, tm) // tm
        # Guarantee >=2 independent output tiles so both v7x TensorCores get
        # work (free on single-TC v5e/v6e).
        if m_tiles == 1 and self.n_p // tn == 1 and tn >= 256:
            tn //= 2
        k_steps = self.k_p // self.tk
        # Deeper weight buffering only when there are enough K steps to benefit
        # and the extra buffer still fits comfortably in the VMEM budget.
        w_tile_bytes = self.tk * tn * self.compute_dtype.itemsize
        w_buffers = 3 if (k_steps >= 4 and
                          3 * w_tile_bytes < self.vmem_limit // 3) else 2
        return _forward(x, self.w_p, self.b_p, d_out=self.d_out,
                        tm=tm, tn=tn, tk=self.tk,
                        vmem_limit=self.vmem_limit, w_buffers=w_buffers)


if __name__ == "__main__":
    key = jax.random.PRNGKey(0)
    k_x, k_w, k_b = jax.random.split(key, 3)

    # Small, deterministic shapes (deliberately not 128-aligned to exercise the
    # one-time padding path and the ragged-edge slicing).
    batch, input_dim, output_dim = 8, 320, 200

    x = jax.random.normal(k_x, (batch, input_dim), dtype=jnp.float32)
    bound = 1.0 / jnp.sqrt(jnp.float32(input_dim))
    weight = jax.random.uniform(k_w, (output_dim, input_dim),
                                minval=-bound, maxval=bound, dtype=jnp.float32)
    bias = jax.random.uniform(k_b, (output_dim,),
                              minval=-bound, maxval=bound, dtype=jnp.float32)

    # Reference: PyTorch forward semantics y = x @ W.T + b.
    y_ref = jnp.dot(x, weight.T, precision=lax.Precision.HIGHEST) + bias

    # Production config: bf16 operands, large lane-dense tiles, f32 accumulate.
    clf = PallasClassifier(weight, bias)
    y = jax.block_until_ready(clf(x))
    assert y.shape == (batch, output_dim)
    assert jnp.allclose(y, y_ref, atol=3e-2, rtol=3e-2), (
        float(jnp.max(jnp.abs(y - y_ref))))

    # Full-f32 path with deliberately tiny tile caps so the (M, N, K) grid has
    # multiple N and K steps (exercises accumulate-into-output + bias finalize).
    clf_f32 = PallasClassifier(weight, bias, compute_dtype=jnp.float32,
                               tm_cap=8, tn_cap=128, tk_cap=128)
    y32 = jax.block_until_ready(clf_f32(x))
    assert jnp.allclose(y32, y_ref, atol=1e-4, rtol=1e-4), (
        float(jnp.max(jnp.abs(y32 - y_ref))))

    print("KERNEL_OK")
</pallas_src>

<mosaic_0001>
module attributes {stable_mosaic.version = 11 : i64} {
  func.func @_linear_bias_kernel(%arg0: i32, %arg1: i32, %arg2: i32, %arg3: memref<16x384xbf16, #tpu.memory_space<vmem>>, %arg4: memref<384x128xbf16, #tpu.memory_space<vmem>>, %arg5: memref<1x128xf32, #tpu.memory_space<vmem>>, %arg6: memref<16x128xf32, #tpu.memory_space<vmem>>) attributes {dimension_semantics = [#tpu.dimension_semantics<parallel>, #tpu.dimension_semantics<parallel>, #tpu.dimension_semantics<arbitrary>], iteration_bounds = array<i64: 1, 2, 1>, scalar_prefetch = 0 : i64, scratch_operands = 0 : i64, tpu.core_type = #tpu.core_type<tc>, window_params = [{transform_indices = @transform_0, window_bounds = array<i64: 16, 384>}, {transform_indices = @transform_1, window_bounds = array<i64: 384, 128>}, {transform_indices = @transform_2, window_bounds = array<i64: 1, 128>}, {transform_indices = @transform_3, window_bounds = array<i64: 16, 128>}]} {
    %c0_i32 = arith.constant 0 : i32
    %0 = arith.cmpi eq, %arg2, %c0_i32 : i32
    %1 = arith.extui %0 : i1 to i32
    %c0_i32_0 = arith.constant 0 : i32
    %2 = arith.cmpi ne, %1, %c0_i32_0 : i32
    scf.if %2 {
      %cst_10 = arith.constant 0.000000e+00 : f32
      %12 = vector.broadcast %cst_10 : f32 to vector<16x128xf32>
      %c0_11 = arith.constant 0 : index
      %c0_12 = arith.constant 0 : index
      %13 = vector.load %arg6[%c0_11, %c0_12] : memref<16x128xf32, #tpu.memory_space<vmem>>, vector<16x128xf32>
      tpu.vector_store %arg6[%c0_11, %c0_12], %12 {strides = array<i32>} : memref<16x128xf32, #tpu.memory_space<vmem>>, vector<16x128xf32>,
    } else {
    }
    %c0 = arith.constant 0 : index
    %c0_1 = arith.constant 0 : index
    %3 = vector.load %arg6[%c0, %c0_1] : memref<16x128xf32, #tpu.memory_space<vmem>>, vector<16x128xf32>
    %c0_2 = arith.constant 0 : index
    %c0_3 = arith.constant 0 : index
    %4 = vector.load %arg3[%c0_2, %c0_3] : memref<16x384xbf16, #tpu.memory_space<vmem>>, vector<16x384xbf16>
    %c0_4 = arith.constant 0 : index
    %c0_5 = arith.constant 0 : index
    %5 = vector.load %arg4[%c0_4, %c0_5] : memref<384x128xbf16, #tpu.memory_space<vmem>>, vector<384x128xbf16>
    %cst = arith.constant dense<0.000000e+00> : vector<16x128xf32>
    %6 = tpu.matmul %4, %5, %cst {dimension_numbers = #tpu.dot_dimension_numbers<[1], [0], [0], [1], [0, 0, 1, 1], [], []>} : vector<16x384xbf16>, vector<384x128xbf16>, vector<16x128xf32> -> vector<16x128xf32>
    %7 = arith.addf %3, %6 : vector<16x128xf32>
    %c0_6 = arith.constant 0 : index
    %c0_7 = arith.constant 0 : index
    %8 = vector.load %arg6[%c0_6, %c0_7] : memref<16x128xf32, #tpu.memory_space<vmem>>, vector<16x128xf32>
    tpu.vector_store %arg6[%c0_6, %c0_7], %7 {strides = array<i32>} : memref<16x128xf32, #tpu.memory_space<vmem>>, vector<16x128xf32>,
    %c0_i32_8 = arith.constant 0 : i32
    %9 = arith.cmpi eq, %arg2, %c0_i32_8 : i32
    %10 = arith.extui %9 : i1 to i32
    %c0_i32_9 = arith.constant 0 : i32
    %11 = arith.cmpi ne, %10, %c0_i32_9 : i32
    scf.if %11 {
      %c0_10 = arith.constant 0 : index
      %c0_11 = arith.constant 0 : index
      %12 = vector.load %arg6[%c0_10, %c0_11] : memref<16x128xf32, #tpu.memory_space<vmem>>, vector<16x128xf32>
      %c0_12 = arith.constant 0 : index
      %c0_13 = arith.constant 0 : index
      %13 = vector.load %arg5[%c0_12, %c0_13] : memref<1x128xf32, #tpu.memory_space<vmem>>, vector<1x128xf32>
      %14 = vector.broadcast %13 : vector<1x128xf32> to vector<16x128xf32>
      %15 = arith.addf %12, %14 : vector<16x128xf32>
      %c0_14 = arith.constant 0 : index
      %c0_15 = arith.constant 0 : index
      %16 = vector.load %arg6[%c0_14, %c0_15] : memref<16x128xf32, #tpu.memory_space<vmem>>, vector<16x128xf32>
      tpu.vector_store %arg6[%c0_14, %c0_15], %15 {strides = array<i32>} : memref<16x128xf32, #tpu.memory_space<vmem>>, vector<16x128xf32>,
    } else {
    }
    return
  }
  func.func @transform_0(%arg0: i32, %arg1: i32, %arg2: i32) -> (i32, i32) {
    %c0_i32 = arith.constant 0 : i32
    return %arg0, %arg2 : i32, i32
  }
  func.func @transform_1(%arg0: i32, %arg1: i32, %arg2: i32) -> (i32, i32) {
    %c0_i32 = arith.constant 0 : i32
    return %arg2, %arg1 : i32, i32
  }
  func.func @transform_2(%arg0: i32, %arg1: i32, %arg2: i32) -> (i32, i32) {
    %c0_i32 = arith.constant 0 : i32
    %c0_i32_0 = arith.constant 0 : i32
    return %c0_i32, %arg1 : i32, i32
  }
  func.func @transform_3(%arg0: i32, %arg1: i32, %arg2: i32) -> (i32, i32) {
    %c0_i32 = arith.constant 0 : i32
    return %arg0, %arg1 : i32, i32
  }
}

</mosaic_0001>

<bundles_post_ra>
// kernel: _forward.1
= control target key start
LH: loop header
LB: loop body
LE: loop exit
PB: predicated region body
PF: predicated region fallthrough
CT: control target
= control target key end

     0   :  { %8 = vsyncpa [#allocation3], 0  ;;  %s1165_s0 = inlined_call_operand.vmem [shape: bf16[16,384], index: 0, kind: input, shape index: {}]   ;;  %s1166_s1 = inlined_call_operand.hbm [shape: bf16[384,256], index: 1, kind: input, shape index: {}]   ;;  %s1167_s2 = inlined_call_operand.vmem [shape: f32[1,256], index: 2, kind: input, shape index: {}]   ;;  %s1168_s3 = inlined_call_operand.vmem [shape: f32[16,256], index: 3, kind: output, shape index: {}]  }
   0x1   :  { %10 = vsyncpa [#allocation3 + $0x1], 0  ;;  %s1018_s12 = smov 0   ;;  %s1020_s13 = smov 0  }
   0x2   :  { %s1022_s14 = smov 0   ;;  %s1024_s15 = smov 0  }
   0x3   :  { %s1026_s16 = smov 0   ;;  %s1028_s17 = smov 0  }
   0x4 LB: > { %s704_s18 = sadd.s32 4294967295, %s993_s17   ;;  %s31_s19 = sadd.s32 1, %s989_s16  ;;  %s993_s17 = sphi %s1028_s17, %s16_s17   ;;  %s989_s16 = sphi %s1026_s16, %s1176_s16   ;;  %s985_s15 = sphi %s1024_s15, %s1175_s15   ;;  %s981_s14 = sphi %s1022_s14, %s1174_s14   ;;  %s977_s13 = sphi %s1020_s13, %s1173_s13   ;;  %s973_s12 = sphi %s1018_s12, %s1172_s12  }
   0x5   : > { %p33_p0 = scmp.ge.s32.totalorder %s31_s19, 2  ;;  %s72_s20 = sadd.s32 1, %s981_s14 }
   0x6   : > { %p79_p1 = scmp.ne.s32.totalorder %s981_s14, %s977_s13  ;;  %p80_p2 = scmp.eq.s32.totalorder %s993_s17, 0 }
   0x7   : > { %s1178_s19 = smov (%p33_p0, %s31_s19), 0  ;;  %p85_p4 = scmp.ne.s32.totalorder %s977_s13, %s973_s12 }
   0x8   : > { %p1054_p3 = por %p80_p2, %p79_p1  ;;  %s68_s22 = ssub.s32 %s989_s16, %s1178_s19 }
   0x9   : > { %p86_p5 = scmp.eq.s32.totalorder %s704_s18, 0  ;;  %p70_p6 = scmp.eq.s32.totalorder %s68_s22, 0 }
   0xa   : > { %p137_p7 = scmp.eq.s32.totalorder %s704_s18, 1  ;;  %p859_p10 = scmp.lt.s32.totalorder %s993_s17, 2 }
   0xb   : > { %p1061_p8 = por %p86_p5, %p85_p4  ;;  %s178_s26 = sand.u32 1, %s981_s14  }
   0xc   : > { %s1066_s24 = scalar_select %p70_p6, %s981_s14, %s72_s20  }
   0xd   : > { %p1068_p9 = por %p137_p7, %p79_p1  ;;  %s709_s27 = sshll.u32 %s989_s16, 2 }
   0xe   : > { %s851_s28 = smul.u32 192, %s178_s26  ;;  %s189_s4 = scalar_lea.hbm %s1166_s1, %s709_s27 }
   0xf   : > { %p856_p11 = pnand %p859_p10, %p1054_p3  ;;  %s190_s5 = sshll.u32 %s189_s4, 4  ;;  %s191_s5 = int_to_ptr.hbm [resolvable:$true] %s190_s5 }
  0x10   : > { %s182_s6 = scalar_lea.vmem [#allocation2], %s851_s28  ;;  %p710_p12 = scmp.ge.s32.totalorder %s993_s17, 1 }
  0x11   : > { %s192_s7 = sshll.u32 %s182_s6, 4  ;;  %s179_s8 = scalar_lea.sflag [#allocation3], %s178_s26  ;;  %s193_s7 = int_to_ptr.vmem [resolvable:$true] %s192_s7 }
  0x12   : > { %s995_s9 = smov 128   ;;  %s996_s10 = smov 64  }
  0x13   : > { %s997_s11 = smov 4   ;;  %p206_p13 = scmp.lt.s32.totalorder %s993_s17, 3 }
  0x14   : > { %858 = dma.hbm_to_vmem [thread:$0]  (!%p856_p11), %s191_s5, 3072, %s193_s7, %s179_s8, %s995_s9, %s996_s10, %s997_s11  }
  0x15   : > { %p207_p0 = pnand %p710_p12, %p206_p13 }
  0x16   : > { %s1083_s12 = sand.u32 (!%p207_p0), 1, %s977_s13  }
  0x17   : > { %210 = sbr.rel (%p207_p0) target bundleno = 216 (0xd8), region = 32  ;;  %s213_s20 = scalar_lea.sflag (!%p207_p0), [#allocation3], %s1083_s12 }
  0x18   : > { %s852_s18 = smul.u32 (!%p207_p0), 192, %s1083_s12 }
  0x1a   : > { %s1087_s21 = scalar_lea.vmem (!%p207_p0), [#allocation2], %s852_s18 }
  0x1c   : > { %968 = dma.done.wait (%p1061_p8), %s213_s20, 3072  }
  0x1d   : > { %970 = vsyncadd (%p1061_p8), %s213_s20, 4294964224  ;;  %v834_v0 = vld [vmem:[%s1087_s21 + $0x38] sm:$0xff]  ;;  %v833_v3 = vld [vmem:[%s1087_s21 + $0x30] sm:$0xff]  ;;  %p265_p1 = scmp.lt.s32.totalorder %s985_s15, 1  ;;  %s711_s20 = sshll.u32 %s1083_s12, 4 }
  0x1e   : > { %v842_v1 = vld [vmem:[%s1087_s21 + $0x78] sm:$0xff]  ;;  %489 = vmatpush.bf16.msra.mxu0 %v834_v0  ;;  %v841_v4 = vld [vmem:[%s1087_s21 + $0x70] sm:$0xff]  ;;  %v832_v6 = vld [vmem:[%s1087_s21 + $0x28] sm:$0xff]  ;;  %s821_s22 = sshll.u32 (%p1068_p9), %s985_s15, 3 }
  0x1f   : > { %v850_v2 = vld [vmem:[%s1087_s21 + $0xb8] sm:$0xff]  ;;  %503 = vmatpush.bf16.msra.mxu1 %v842_v1  ;;  %v849_v5 = vld [vmem:[%s1087_s21 + $0xb0] sm:$0xff]  ;;  %v840_v7 = vld [vmem:[%s1087_s21 + $0x68] sm:$0xff]  ;;  %s266_s9 = scalar_select %p265_p1, %s985_s15, 1 }
  0x20   : > { %517 = vmatpush.bf16.msra.mxu2 %v850_v2  ;;  %v848_v8 = vld [vmem:[%s1087_s21 + $0xa8] sm:$0xff]  ;;  %v831_v9 = vld [vmem:[%s1087_s21 + $0x20] sm:$0xff]  ;;  %v830_v12 = vld [vmem:[%s1087_s21 + $0x18] sm:$0xff]  ;;  %s559_s26 = scalar_lea.vmem (%p1068_p9), %s1168_s3, %s821_s22 }
  0x21   : > { %v839_v10 = vld [vmem:[%s1087_s21 + $0x60] sm:$0xff]  ;;  %v838_v13 = vld [vmem:[%s1087_s21 + $0x58] sm:$0xff]  ;;  %v829_v15 = vld [vmem:[%s1087_s21 + $0x10] sm:$0xff]  ;;  %s267_s18 = scalar_lea.vmem %s1167_s2, %s266_s9 }
  0x22   : > { %490 = vmatpush.bf16.msra.mxu0 %v833_v3  ;;  %v847_v11 = vld [vmem:[%s1087_s21 + $0xa0] sm:$0xff]  ;;  %v846_v14 = vld [vmem:[%s1087_s21 + $0x98] sm:$0xff]  ;;  %v837_v16 = vld [vmem:[%s1087_s21 + $0x50] sm:$0xff] }
  0x23   : > { %504 = vmatpush.bf16.msra.mxu1 %v841_v4  ;;  %v845_v17 = vld [vmem:[%s1087_s21 + $0x90] sm:$0xff]  ;;  %v828_v18 = vld [vmem:[%s1087_s21 + $0x8] sm:$0xff]  ;;  %v827_v21 = vld [vmem:[%s1087_s21] sm:$0xff] }
  0x24   : > { %518 = vmatpush.bf16.msra.mxu2 %v849_v5  ;;  %v836_v19 = vld [vmem:[%s1087_s21 + $0x48] sm:$0xff]  ;;  %v835_v22 = vld [vmem:[%s1087_s21 + $0x40] sm:$0xff]  ;;  %v716_v26 = vld [vmem:[%s1165_s0 + $0xc] sm:$0xf0] }
  0x25   : > { %v844_v20 = vld [vmem:[%s1087_s21 + $0x88] sm:$0xff]  ;;  %v714_v23 = vld [vmem:[%s1165_s0] sm:$0xf]  ;;  %v824_v25 = vld [vmem:[%s1165_s0 + $0x4] sm:$0xf] }
  0x26   : > { %491 = vmatpush.bf16.msra.mxu0 %v832_v6  ;;  %v825_v24 = vld [vmem:[%s1165_s0 + $0x8] sm:$0xf0]  ;;  %v843_v27 = vld [vmem:[%s1087_s21 + $0x80] sm:$0xff]  ;;  %v722_v28 = vld [vmem:[%s1165_s0 + $0x8] sm:$0xf]  ;;  %v719_v31 = vor.u32 %v824_v25, %v716_v26  ;;  %s251_s21 = scalar_lea.vmem [#allocation4], %s711_s20 }
  0x27   : > { %505 = vmatpush.bf16.msra.mxu1 %v840_v7  ;;  %v826_v29 = vld [vmem:[%s1165_s0 + $0x10] sm:$0xf0]  ;;  %v715_v30 = vor.u32 %v825_v24, %v714_v23  ;;  %v912_v38 = vld [vmem:[%s267_s18] ss:$0 sm:$0xff] }
  0x28   : > { %519 = vmatpush.bf16.msra.mxu2 %v848_v8  ;;  %v723_v32 = vor.u32 %v826_v29, %v722_v28 }
  0x2a   : > { %492 = vmatpush.bf16.msra.mxu0 %v831_v9 }
  0x2b   : > { %506 = vmatpush.bf16.msra.mxu1 %v839_v10 }
  0x2c   : > { %520 = vmatpush.bf16.msra.mxu2 %v847_v11 }
  0x2e   : > { %493 = vmatpush.bf16.msra.mxu0 %v830_v12 }
  0x2f   : > { %507 = vmatpush.bf16.msra.mxu1 %v838_v13 }
  0x30   : > { %521 = vmatpush.bf16.msra.mxu2 %v846_v14 }
  0x32   : > { %494 = vmatpush.bf16.msra.mxu0 %v829_v15 }
  0x33   : > { %508 = vmatpush.bf16.msra.mxu1 %v837_v16 }
  0x34   : > { %522 = vmatpush.bf16.msra.mxu2 %v845_v17 }
  0x36   : > { %495 = vmatpush.bf16.msra.mxu0 %v828_v18 }
  0x37   : > { %509 = vmatpush.bf16.msra.mxu1 %v836_v19 }
  0x38   : > { %523 = vmatpush.bf16.msra.mxu2 %v844_v20 }
  0x3a   : > { %496 = vmatpush.bf16.msra.mxu0 %v827_v21 }
  0x3b   : > { %510 = vmatpush.bf16.msra.mxu1 %v835_v22 }
  0x3c   : > { %524 = vmatpush.bf16.msra.mxu2 %v843_v27 }
  0x3d   : > { %497 = vmatmul.bf16.vlgmr.msra.gmra.mxu0 %v715_v30 }
  0x3e   : > { %511 = vmatmul.bf16.vlgmr.msra.gmra.mxu1 %v719_v31 }
  0x3f   : > { %525 = vmatmul.bf16.vlgmr.msra.gmra.mxu2 %v723_v32 }
  0xba   : > { %v498_v33 = vpop.f32.mrf.mxu0 }
  0xbb   : > { %v512_v34 = vpop.f32.mrf.mxu1 }
  0xbc   : > { %v513_v35 = vadd.f32 %v512_v34, %v498_v33 }
  0xc2   : > { %v526_v36 = vpop.f32.mrf.mxu2  ;;  %v500_v39 = vpop.f32.mrf.mxu0 }
  0xc3   : > { %v527_v37 = vadd.f32 %v526_v36, %v513_v35  ;;  %v514_v40 = vpop.f32.mrf.mxu1 }
  0xc4   : > { %v515_v42 = vadd.f32 %v514_v40, %v500_v39 }
  0xc5   : > { %v544_v41 = vadd.f32 %v912_v38, %v527_v37 }
  0xc7   : > { %546 = vst [vmem:[%s251_s21] sm:$0xff] %v544_v41 }
  0xca   : > { %v528_v43 = vpop.f32.mrf.mxu2 }
  0xcb   : > { %v529_v44 = vadd.f32 %v528_v43, %v515_v42  ;;  %554 = sbr.rel (!%p1068_p9) target bundleno = 216 (0xd8), region = 48 }
  0xcd   : > { %v545_v45 = vadd.f32 %v912_v38, %v529_v44 }
  0xce   : > { %v590_v46 = vld [vmem:[%s251_s21] sm:$0xff] (%p1068_p9) }
  0xcf   : > { %547 = vst [vmem:[%s251_s21 + $0x8] sm:$0xff] %v545_v45 }
  0xd0   : > { %591 = vst [vmem:[%s559_s26] sm:$0xff] %v590_v46 }
  0xd6   : > { %v592_v47 = vld [vmem:[%s251_s21 + $0x8] sm:$0xff] }
  0xd7   : > { %593 = vst [vmem:[%s559_s26 + $0x10] sm:$0xff] %v592_v47 }
  0xd8 PF: > { %s16_s17 = sadd.s32 1, %s993_s17   ;;  %s1172_s12 = smov %s977_s13 }
  0xd9   : > { %p13_p2 = scmp.ge.s32.totalorder %s16_s17, 4   ;;  %s1173_s13 = smov %s981_s14 }
  0xda   : > { %s1174_s14 = smov %s1066_s24  ;;  %s1175_s15 = smov %s989_s16 }
  0xdb   : > { %s1176_s16 = smov %s1178_s19  ;;  %15 = sbr.rel (!%p13_p2) target bundleno = 4 (0x4), region = 124 }
  0xe0   :  { %609 = vsyncpa [#allocation3], 1 }
  0xe1   :  { %611 = vsyncpa [#allocation3 + $0x1], 1 }

</bundles_post_ra>
